<compile_context>
chip_gen: v7x
topology: tpu7x:2x2x1
jax: 0.10.0
libtpu: 0.0.40
codegen_flags: <defaults>
</compile_context>

<pallas_src>
import jax
import jax.numpy as jnp
from jax.experimental import pallas as pl
from jax.experimental.pallas import tpu as pltpu  # noqa: F401  (kept for TPU-specific tuning hooks)

REP_SIZE = 16      # hyperparams['rep-size']
H_SIZE   = 32      # hyperparams['rep-h-size']
BATCH    = 16
V_PAD    = 128     # lane-dense padded feature width (multiple of 128 lanes)

# variable sizes (v_size) for a small synthetic causal graph; all tabular.
V_SIZES = {"a": 4, "b": 3, "c": 6}


# ----------------------------- Pallas kernel ------------------------------ #
def _repr_nn_kernel(x_ref, w1_ref, b1_ref, wm_ref, bm_ref, wo_ref, bo_ref,
                    out_ref):
    """Fused encode->decode for ALL variables in one shot.

    x_ref:  (B, V_PAD)        concatenated + zero-padded inputs
    w1_ref: (V_PAD, n*H)      block-diagonal encoder layer-1 weights
    wm_ref: (n*H, n*H)        block-diagonal fused (we2 @ wd1) mid weights
    wo_ref: (n*H, V_PAD)      block-diagonal decoder layer-2 weights
    Three dependent MXU matmuls; everything resident in VMEM.
    """
    x = x_ref[...]                                            # (B, V_PAD) f32

    # encoder layer 1: Linear -> ReLU    (all variables at once)
    h = jnp.dot(x, w1_ref[...], preferred_element_type=jnp.float32) + b1_ref[...]
    h = jnp.maximum(h, 0.0)                                   # (B, n*H)

    # fused [encoder layer 2  @  decoder layer 1]: Linear -> ReLU
    g = jnp.dot(h, wm_ref[...], preferred_element_type=jnp.float32) + bm_ref[...]
    g = jnp.maximum(g, 0.0)                                   # (B, n*H)

    # decoder layer 2: Linear  (padding lanes stay exactly zero)
    recon = jnp.dot(g, wo_ref[...], preferred_element_type=jnp.float32) + bo_ref[...]
    out_ref[...] = recon.astype(out_ref.dtype)                # (B, V_PAD) lane-dense


def fused_forward(x_padded, params):
    """x_padded: (B, V_PAD) f32.  params: 6 block-diagonal packed arrays.
    Single un-gridded pallas_call; whole-array blocks live in VMEM."""
    B = x_padded.shape[0]
    return pl.pallas_call(
        _repr_nn_kernel,
        out_shape=jax.ShapeDtypeStruct((B, V_PAD), jnp.float32),
    )(x_padded, *params)


# --------------------------- parameter creation ---------------------------- #
def _linear_init(key, fan_in, fan_out):
    """PyTorch-style nn.Linear init (uniform +-1/sqrt(fan_in)), stored (in, out)."""
    kw, kb = jax.random.split(key)
    bound = 1.0 / (fan_in ** 0.5)
    w = jax.random.uniform(kw, (fan_in, fan_out), jnp.float32, -bound, bound)
    b = jax.random.uniform(kb, (1, fan_out), jnp.float32, -bound, bound)
    return w, b


def make_params(key, v_sizes):
    """Returns (packed, raw):
       packed: block-diagonal weights + metadata for the single fused kernel
       raw:    per-variable unpadded params (for the pure-JAX reference)."""
    names = sorted(v_sizes)
    n = len(names)
    nh = n * H_SIZE

    offsets, off = {}, 0
    for v in names:
        offsets[v] = off
        off += v_sizes[v]
    total_in = off
    assert total_in <= V_PAD

    W1 = jnp.zeros((V_PAD, nh), jnp.float32)
    b1 = jnp.zeros((1, nh), jnp.float32)
    Wm = jnp.zeros((nh, nh), jnp.float32)
    bm = jnp.zeros((1, nh), jnp.float32)
    Wo = jnp.zeros((nh, V_PAD), jnp.float32)
    bo = jnp.zeros((1, V_PAD), jnp.float32)

    raw = {}
    for i, v in enumerate(names):
        key, k1, k2, k3, k4 = jax.random.split(key, 5)
        v_in = v_sizes[v]
        we1, be1 = _linear_init(k1, v_in, H_SIZE)        # encoder layer 1
        we2, be2 = _linear_init(k2, H_SIZE, REP_SIZE)    # encoder layer 2
        wd1, bd1 = _linear_init(k3, REP_SIZE, H_SIZE)    # decoder layer 1
        wd2, bd2 = _linear_init(k4, H_SIZE, v_in)        # decoder layer 2
        raw[v] = (we1, be1, we2, be2, wd1, bd1, wd2, bd2)

        o = offsets[v]
        h0, h1 = i * H_SIZE, (i + 1) * H_SIZE

        # block-diagonal encoder layer 1
        W1 = W1.at[o:o + v_in, h0:h1].set(we1)
        b1 = b1.at[:, h0:h1].set(be1)

        # algebraic fusion of encoder layer 2 with decoder layer 1
        wm_i = we2 @ wd1                                  # (H, H)
        bm_i = be2 @ wd1 + bd1                            # (1, H)
        Wm = Wm.at[h0:h1, h0:h1].set(wm_i)
        bm = bm.at[:, h0:h1].set(bm_i)

        # block-diagonal decoder layer 2 (padding cols stay zero)
        Wo = Wo.at[h0:h1, o:o + v_in].set(wd2)
        bo = bo.at[:, o:o + v_in].set(bd2)

    packed = {"names": names, "offsets": offsets, "sizes": dict(v_sizes),
              "total_in": total_in, "params": (W1, b1, Wm, bm, Wo, bo)}
    return packed, raw


# ------------------------------ model forward ------------------------------ #
def representational_nn_forward(v_dict, packed):
    """Equivalent of RepresentationalNN.forward(v_dict) (default path):
    every variable is encoded by its own encoder then decoded — all variables
    share ONE un-gridded Pallas launch via block-diagonal weights."""
    names = packed["names"]
    x_cat = jnp.concatenate([v_dict[v].astype(jnp.float32) for v in names],
                            axis=1)                               # (B, total_in)
    x_pad = jnp.pad(x_cat, ((0, 0), (0, V_PAD - x_cat.shape[1])))  # (B, V_PAD)
    recon = fused_forward(x_pad, packed["params"])                 # (B, V_PAD)
    out = {}
    for v in names:
        o = packed["offsets"][v]
        out[v] = recon[:, o:o + v_dict[v].shape[1]]
    return out


def _reference_forward(v_dict, raw_params):
    out = {}
    for v, x in v_dict.items():
        we1, be1, we2, be2, wd1, bd1, wd2, bd2 = raw_params[v]
        h = jnp.maximum(x @ we1 + be1, 0.0)
        rep = h @ we2 + be2
        g = jnp.maximum(rep @ wd1 + bd1, 0.0)
        out[v] = g @ wd2 + bd2
    return out


if __name__ == "__main__":
    key = jax.random.PRNGKey(0)
    key, pkey = jax.random.split(key)
    packed, raw = make_params(pkey, V_SIZES)

    v_dict = {}
    for v in sorted(V_SIZES):
        key, xk = jax.random.split(key)
        v_dict[v] = jax.random.normal(xk, (BATCH, V_SIZES[v]), jnp.float32)

    recon = representational_nn_forward(v_dict, packed)
    recon = jax.tree_util.tree_map(jax.block_until_ready, recon)

    ref = _reference_forward(v_dict, raw)
    for v in recon:
        assert recon[v].shape == v_dict[v].shape
        assert jnp.allclose(recon[v], ref[v], atol=1e-4, rtol=1e-4)

    print("KERNEL_OK")
</pallas_src>

<mosaic_0001>
module attributes {stable_mosaic.version = 11 : i64} {
  func.func @_repr_nn_kernel(%arg0: memref<16x128xf32, #tpu.memory_space<vmem>>, %arg1: memref<128x96xf32, #tpu.memory_space<vmem>>, %arg2: memref<1x96xf32, #tpu.memory_space<vmem>>, %arg3: memref<96x96xf32, #tpu.memory_space<vmem>>, %arg4: memref<1x96xf32, #tpu.memory_space<vmem>>, %arg5: memref<96x128xf32, #tpu.memory_space<vmem>>, %arg6: memref<1x128xf32, #tpu.memory_space<vmem>>, %arg7: memref<16x128xf32, #tpu.memory_space<vmem>>) attributes {dimension_semantics = [], scalar_prefetch = 0 : i64, scratch_operands = 0 : i64, tpu.core_type = #tpu.core_type<tc>} {
    %c0 = arith.constant 0 : index
    %c0_0 = arith.constant 0 : index
    %0 = vector.load %arg0[%c0, %c0_0] : memref<16x128xf32, #tpu.memory_space<vmem>>, vector<16x128xf32>
    %c0_1 = arith.constant 0 : index
    %c0_2 = arith.constant 0 : index
    %1 = vector.load %arg1[%c0_1, %c0_2] : memref<128x96xf32, #tpu.memory_space<vmem>>, vector<128x96xf32>
    %cst = arith.constant dense<0.000000e+00> : vector<16x96xf32>
    %2 = tpu.matmul %0, %1, %cst {dimension_numbers = #tpu.dot_dimension_numbers<[1], [0], [0], [1], [0, 0, 1, 1], [], []>} : vector<16x128xf32>, vector<128x96xf32>, vector<16x96xf32> -> vector<16x96xf32>
    %c0_3 = arith.constant 0 : index
    %c0_4 = arith.constant 0 : index
    %3 = vector.load %arg2[%c0_3, %c0_4] : memref<1x96xf32, #tpu.memory_space<vmem>>, vector<1x96xf32>
    %4 = vector.broadcast %3 : vector<1x96xf32> to vector<16x96xf32>
    %5 = arith.addf %2, %4 : vector<16x96xf32>
    %cst_5 = arith.constant 0.000000e+00 : f32
    %6 = vector.broadcast %cst_5 : f32 to vector<16x96xf32>
    %7 = arith.maximumf %5, %6 : vector<16x96xf32>
    %c0_6 = arith.constant 0 : index
    %c0_7 = arith.constant 0 : index
    %8 = vector.load %arg3[%c0_6, %c0_7] : memref<96x96xf32, #tpu.memory_space<vmem>>, vector<96x96xf32>
    %cst_8 = arith.constant dense<0.000000e+00> : vector<16x96xf32>
    %9 = tpu.matmul %7, %8, %cst_8 {dimension_numbers = #tpu.dot_dimension_numbers<[1], [0], [0], [1], [0, 0, 1, 1], [], []>} : vector<16x96xf32>, vector<96x96xf32>, vector<16x96xf32> -> vector<16x96xf32>
    %c0_9 = arith.constant 0 : index
    %c0_10 = arith.constant 0 : index
    %10 = vector.load %arg4[%c0_9, %c0_10] : memref<1x96xf32, #tpu.memory_space<vmem>>, vector<1x96xf32>
    %11 = vector.broadcast %10 : vector<1x96xf32> to vector<16x96xf32>
    %12 = arith.addf %9, %11 : vector<16x96xf32>
    %cst_11 = arith.constant 0.000000e+00 : f32
    %13 = vector.broadcast %cst_11 : f32 to vector<16x96xf32>
    %14 = arith.maximumf %12, %13 : vector<16x96xf32>
    %c0_12 = arith.constant 0 : index
    %c0_13 = arith.constant 0 : index
    %15 = vector.load %arg5[%c0_12, %c0_13] : memref<96x128xf32, #tpu.memory_space<vmem>>, vector<96x128xf32>
    %cst_14 = arith.constant dense<0.000000e+00> : vector<16x128xf32>
    %16 = tpu.matmul %14, %15, %cst_14 {dimension_numbers = #tpu.dot_dimension_numbers<[1], [0], [0], [1], [0, 0, 1, 1], [], []>} : vector<16x96xf32>, vector<96x128xf32>, vector<16x128xf32> -> vector<16x128xf32>
    %c0_15 = arith.constant 0 : index
    %c0_16 = arith.constant 0 : index
    %17 = vector.load %arg6[%c0_15, %c0_16] : memref<1x128xf32, #tpu.memory_space<vmem>>, vector<1x128xf32>
    %18 = vector.broadcast %17 : vector<1x128xf32> to vector<16x128xf32>
    %19 = arith.addf %16, %18 : vector<16x128xf32>
    %c0_17 = arith.constant 0 : index
    %c0_18 = arith.constant 0 : index
    %20 = vector.load %arg7[%c0_17, %c0_18] : memref<16x128xf32, #tpu.memory_space<vmem>>, vector<16x128xf32>
    tpu.vector_store %arg7[%c0_17, %c0_18], %19 {strides = array<i32>} : memref<16x128xf32, #tpu.memory_space<vmem>>, vector<16x128xf32>,
    return
  }
}

</mosaic_0001>

<bundles_post_ra>
// kernel: tpu_custom_call.1
= control target key start
LH: loop header
LB: loop body
LE: loop exit
PB: predicated region body
PF: predicated region fallthrough
CT: control target
= control target key end

     0   :  { %s793_s0 = inlined_call_operand.vmem [shape: f32[16,128], index: 0, kind: input, shape index: {}]   ;;  %s794_s1 = inlined_call_operand.vmem [shape: f32[128,96], index: 1, kind: input, shape index: {}]   ;;  %s795_s2 = inlined_call_operand.vmem [shape: f32[1,96], index: 2, kind: input, shape index: {}]   ;;  %s796_s3 = inlined_call_operand.vmem [shape: f32[96,96], index: 3, kind: input, shape index: {}]   ;;  %s797_s4 = inlined_call_operand.vmem [shape: f32[1,96], index: 4, kind: input, shape index: {}]   ;;  %s798_s5 = inlined_call_operand.vmem [shape: f32[96,128], index: 5, kind: input, shape index: {}]   ;;  %s799_s6 = inlined_call_operand.vmem [shape: f32[1,128], index: 6, kind: input, shape index: {}]   ;;  %s800_s7 = inlined_call_operand.hbm [shape: f32[16,128], index: 7, kind: output, shape index: {}]  }
   0x1   :  { %v29_v0 = vld [vmem:[%s794_s1] sm:$0xff]  ;;  %v30_v1 = vld [vmem:[%s794_s1 + $0x8] sm:$0xff]  ;;  %v31_v2 = vld [vmem:[%s794_s1 + $0x10] sm:$0xff] }
   0x2   :  { %v492_v3 = vpack.c.bf16 %v30_v1, %v29_v0  ;;  %v32_v4 = vld [vmem:[%s794_s1 + $0x18] sm:$0xff]  ;;  %v33_v6 = vld [vmem:[%s794_s1 + $0x20] sm:$0xff]  ;;  %v34_v7 = vld [vmem:[%s794_s1 + $0x28] sm:$0xff] }
   0x3   :  { %v496_v5 = vpack.c.bf16 %v32_v4, %v31_v2  ;;  %v500_v8 = vpack.c.bf16 %v34_v7, %v33_v6  ;;  %v35_v9 = vld [vmem:[%s794_s1 + $0x30] sm:$0xff]  ;;  %v36_v10 = vld [vmem:[%s794_s1 + $0x38] sm:$0xff]  ;;  %v27_v11 = vld [vmem:[%s793_s0] sm:$0xff] }
   0x4   :  { %493 = vmatprep.subr.bf16.mxu0 %v492_v3  ;;  %435 = vmatprep.mubr.f32.mxu0 %v27_v11  ;;  %v129_v12 = vld [vmem:[%s796_s3] sm:$0xff]  ;;  %v130_v13 = vld [vmem:[%s796_s3 + $0x8] sm:$0xff]  ;;  %v131_v14 = vld [vmem:[%s796_s3 + $0x10] sm:$0xff]  ;;  %v504_v20 = vpack.c.bf16 %v36_v10, %v35_v9 }
   0x5   :  { %495 = vmatpush3.bf16.msra.mxu0 %v492_v3  ;;  %v524_v15 = vpack.c.bf16 %v130_v13, %v129_v12  ;;  %v132_v16 = vld [vmem:[%s796_s3 + $0x18] sm:$0xff]  ;;  %v133_v18 = vld [vmem:[%s796_s3 + $0x20] sm:$0xff]  ;;  %v134_v19 = vld [vmem:[%s796_s3 + $0x28] sm:$0xff] }
   0x6   :  { %497 = vmatprep.subr.bf16.mxu0 %v496_v5  ;;  %v528_v17 = vpack.c.bf16 %v132_v16, %v131_v14 }
   0x7   :  { %525 = vmatprep.subr.bf16.mxu1 %v524_v15 }
   0x9   :  { %499 = vmatpush3.bf16.msra.mxu0 %v496_v5 }
   0xa   :  { %501 = vmatprep.subr.bf16.mxu0 %v500_v8 }
   0xb   :  { %12 = vsyncpa [#allocation3], 0  ;;  %v37_v21 = vld [vmem:[%s794_s1 + $0x40] sm:$0xff]  ;;  %v38_v22 = vld [vmem:[%s794_s1 + $0x48] sm:$0xff]  ;;  %527 = vmatpush3.bf16.msra.mxu1 %v524_v15  ;;  %v532_v23 = vpack.c.bf16 %v134_v19, %v133_v18  ;;  %vm148_vm0 = vcmask 785408  }
   0xc   :  { %529 = vmatprep.subr.bf16.mxu1 %v528_v17  ;;  %v135_v24 = vld [vmem:[%s796_s3 + $0x30] sm:$0xff]  ;;  %v136_v25 = vld [vmem:[%s796_s3 + $0x38] sm:$0xff]  ;;  %v508_v26 = vpack.c.bf16 %v38_v22, %v37_v21  ;;  %v137_v30 = vld [vmem:[%s796_s3 + $0x40] sm:$0xff] }
   0xd   :  { %503 = vmatpush3.bf16.msra.mxu0 %v500_v8  ;;  %v39_v27 = vld [vmem:[%s794_s1 + $0x50] sm:$0xff]  ;;  %v40_v28 = vld [vmem:[%s794_s1 + $0x58] sm:$0xff]  ;;  %v536_v29 = vpack.c.bf16 %v136_v25, %v135_v24  ;;  %v138_v31 = vld [vmem:[%s796_s3 + $0x48] sm:$0xff] }
   0xe   :  { %505 = vmatprep.subr.bf16.mxu0 %v504_v20  ;;  %v512_v32 = vpack.c.bf16 %v40_v28, %v39_v27  ;;  %v41_v33 = vld [vmem:[%s794_s1 + $0x60] sm:$0xff]  ;;  %v42_v34 = vld [vmem:[%s794_s1 + $0x68] sm:$0xff]  ;;  %v540_v35 = vpack.c.bf16 %v138_v31, %v137_v30  ;;  %v43_v37 = vld [vmem:[%s794_s1 + $0x70] sm:$0xff] }
   0xf   :  { %531 = vmatpush3.bf16.msra.mxu1 %v528_v17  ;;  %v516_v36 = vpack.c.bf16 %v42_v34, %v41_v33  ;;  %v44_v38 = vld [vmem:[%s794_s1 + $0x78] sm:$0xff]  ;;  %v28_v40 = vld [vmem:[%s793_s0 + $0x8] sm:$0xff]  ;;  %v139_v41 = vld [vmem:[%s796_s3 + $0x50] sm:$0xff] }
  0x10   :  { %533 = vmatprep.subr.bf16.mxu1 %v532_v23  ;;  %v520_v39 = vpack.c.bf16 %v44_v38, %v43_v37  ;;  %v140_v42 = vld [vmem:[%s796_s3 + $0x58] sm:$0xff]  ;;  %v232_v44 = vld [vmem:[%s798_s5] sm:$0xff]  ;;  %v233_v45 = vld [vmem:[%s798_s5 + $0x8] sm:$0xff] }
  0x11   :  { %507 = vmatpush3.bf16.msra.mxu0 %v504_v20  ;;  %v544_v43 = vpack.c.bf16 %v140_v42, %v139_v41  ;;  %v548_v46 = vpack.c.bf16 %v233_v45, %v232_v44  ;;  %v350_v47 = vld [vmem:[%s795_s2] ss:$0 sm:$0xff]  ;;  %v234_v52 = vld [vmem:[%s798_s5 + $0x10] sm:$0xff]  ;;  %v235_v53 = vld [vmem:[%s798_s5 + $0x18] sm:$0xff] }
  0x12   :  { %509 = vmatprep.subr.bf16.mxu0 %v508_v26  ;;  %v552_v56 = vpack.c.bf16 %v235_v53, %v234_v52  ;;  %v236_v57 = vld [vmem:[%s798_s5 + $0x20] sm:$0xff]  ;;  %v237_v58 = vld [vmem:[%s798_s5 + $0x28] sm:$0xff]  ;;  %v238_v60 = vld [vmem:[%s798_s5 + $0x30] sm:$0xff] }
  0x13   :  { %535 = vmatpush3.bf16.msra.mxu1 %v532_v23  ;;  %v556_v59 = vpack.c.bf16 %v237_v58, %v236_v57  ;;  %v239_v61 = vld [vmem:[%s798_s5 + $0x38] sm:$0xff]  ;;  %v240_v63 = vld [vmem:[%s798_s5 + $0x40] sm:$0xff]  ;;  %v241_v0 = vld [vmem:[%s798_s5 + $0x48] sm:$0xff] }
  0x14   :  { %537 = vmatprep.subr.bf16.mxu1 %v536_v29  ;;  %v560_v62 = vpack.c.bf16 %v239_v61, %v238_v60  ;;  %v564_v1 = vpack.c.bf16 %v241_v0, %v240_v63  ;;  %v242_v2 = vld [vmem:[%s798_s5 + $0x50] sm:$0xff]  ;;  %v243_v3 = vld [vmem:[%s798_s5 + $0x58] sm:$0xff]  ;;  %v351_v5 = vld [vmem:[%s797_s4] ss:$0 sm:$0xff]  ;;  %s599_s5 = smov [#allocation2]  }
  0x15   :  { %511 = vmatpush3.bf16.msra.mxu0 %v508_v26  ;;  %v568_v4 = vpack.c.bf16 %v243_v3, %v242_v2  ;;  %v354_v12 = vld [vmem:[%s799_s6] ss:$0 sm:$0xff]  ;;  %s339_s17 = sshll.u32 %s599_s5, 4  ;;  %s340_s17 = int_to_ptr.vmem [resolvable:$true] %s339_s17 }
  0x16   :  { %513 = vmatprep.subr.bf16.mxu0 %v512_v32  ;;  %s575_s4 = scalar_lea.vmem %s340_s17, 256  ;;  %p580_p1 = scmp.lt.s32.totalorder %s340_s17, %s340_s17 }
  0x17   :  { %539 = vmatpush3.bf16.msra.mxu1 %v536_v29  ;;  %p576_p0 = scmp.ne.s32.totalorder %s340_s17, %s575_s4  ;;  %p581_p2 = scmp.lt.s32.totalorder %s575_s4, %s575_s4 }
  0x18   :  { %541 = vmatprep.subr.bf16.mxu1 %v540_v35 }
  0x19   :  { %515 = vmatpush3.bf16.msra.mxu0 %v512_v32  ;;  %p582_p3 = por %p581_p2, %p580_p1 }
  0x1a   :  { %517 = vmatprep.subr.bf16.mxu0 %v516_v36 }
  0x1b   :  { %543 = vmatpush3.bf16.msra.mxu1 %v540_v35  ;;  %p583_p4 = pnand %p582_p3, %p576_p0 }
  0x1c   :  { %545 = vmatprep.subr.bf16.mxu1 %v544_v43 }
  0x1d   :  { %519 = vmatpush3.bf16.msra.mxu0 %v516_v36 }
  0x1e   :  { %521 = vmatprep.subr.bf16.mxu0 %v520_v39 }
  0x1f   :  { %547 = vmatpush3.bf16.msra.mxu1 %v544_v43 }
  0x20   :  { %549 = vmatprep.subr.bf16.mxu1 %v548_v46 }
  0x21   :  { %523 = vmatpush3.bf16.msra.mxu0 %v520_v39 }
  0x24   :  { %436 = vmatmul.mubr.f32.vlgmr.msra.gmra.mrb[0].mxu0 %v28_v40 }
  0xf7   :  { %v437_v48 = vpop.f32.mrb[0].mxu0 }
  0xf8   :  { %v124_v49 = vadd.f32 %v437_v48, %v350_v47  ;;  %v118_v50 = vpop.f32.mrb[1].mxu0 }
  0xf9   :  { %v119_v51 = vadd.f32 %v350_v47, %v118_v50 }
  0xfa   :  { %v128_v55 = vmax.f32 %v124_v49, 0.0 }
  0xfb   :  { %v127_v54 = vmax.f32 %v119_v51, 0.0 }
  0xfd   :  { %462 = vmatprep.mubr.msk.f32.mxu1 %vm148_vm0, %v127_v54 }
  0xfe   :  { %463 = vmatmul.mubr.msk.f32.vlgmr.msra.gmra.mrb[0].mxu1 %vm148_vm0, %v128_v55 }
  0xff   :  { %551 = vmatpush3.bf16.msra.mxu1 %v548_v46 }
 0x100   :  { %553 = vmatprep.subr.bf16.mxu1 %v552_v56 }
 0x103   :  { %555 = vmatpush3.bf16.msra.mxu1 %v552_v56 }
 0x104   :  { %557 = vmatprep.subr.bf16.mxu1 %v556_v59 }
 0x107   :  { %559 = vmatpush3.bf16.msra.mxu1 %v556_v59 }
 0x108   :  { %561 = vmatprep.subr.bf16.mxu1 %v560_v62 }
 0x10b   :  { %563 = vmatpush3.bf16.msra.mxu1 %v560_v62 }
 0x10c   :  { %565 = vmatprep.subr.bf16.mxu1 %v564_v1 }
 0x10f   :  { %567 = vmatpush3.bf16.msra.mxu1 %v564_v1 }
 0x110   :  { %569 = vmatprep.subr.bf16.mxu1 %v568_v4 }
 0x113   :  { %571 = vmatpush3.bf16.msra.mxu1 %v568_v4 }
 0x1d1   :  { %v464_v6 = vpop.f32.mrb[0].mxu1 }
 0x1d2   :  { %v227_v7 = vadd.f32 %v464_v6, %v351_v5  ;;  %v221_v8 = vpop.f32.mrb[1].mxu1 }
 0x1d3   :  { %v222_v9 = vadd.f32 %v351_v5, %v221_v8 }
 0x1d4   :  { %v231_v11 = vmax.f32 %v227_v7, 0.0 }
 0x1d5   :  { %v230_v10 = vmax.f32 %v222_v9, 0.0 }
 0x1d7   :  { %489 = vmatprep.mubr.msk.f32.mxu1 %vm148_vm0, %v230_v10 }
 0x1d8   :  { %490 = vmatmul.mubr.msk.f32.vlgmr.msra.gmra.mrb[2].mxu1 %vm148_vm0, %v231_v11 }
 0x2ab   :  { %v491_v13 = vpop.f32.mrb[2].mxu1 }
 0x2ac   :  { %v329_v14 = vadd.f32 %v491_v13, %v354_v12  ;;  %v323_v15 = vpop.f32.mrb[3].mxu1 }
 0x2ad   :  { %v324_v16 = vadd.f32 %v354_v12, %v323_v15 }
 0x2ae   :  { %333 = vst [vmem:[#allocation2 + $0x8] sm:$0xff] %v329_v14 }
 0x2af   :  { %332 = vst [vmem:[#allocation2] sm:$0xff] %v324_v16 }
 0x2b0   :  { %586 = shalt.err (!%p583_p4)
}
 0x2b1   :  { %s587_s6 = scalar_lea.hbm %s800_s7, 256 }
 0x2b2   :  { %p588_p5 = scmp.ne.s32.totalorder %s800_s7, %s587_s6  ;;  %p591_p6 = scmp.lt.u32.totalorder %s587_s6, %s800_s7 }
 0x2b4   :  { %p593_p7 = pnand %p591_p6, %p588_p5 }
 0x2b6   :  { %596 = shalt.err (!%p593_p7)
}
 0x2b7   :  { %s600_s22 = smov 128   ;;  %s601_s2 = smov 8  }
 0x2b8   :  { %345 = dma.vmem_to_hbm [thread:$0]  %s340_s17, 256, %s800_s7, [#allocation3], %s600_s22, %s600_s22, %s601_s2  }
 0x2b9   :  { %597 = dma.done.wait [#allocation3], 256  }
 0x2ba   :  { %598 = vsyncadd [#allocation3], 4294967040 }
 0x2bb   :  { %349 = vsyncpa [#allocation3], 1 }

</bundles_post_ra>
